<compile_context>
chip_gen: v7x
topology: tpu7x:2x2x1
jax: 0.10.0
libtpu: 0.0.40
codegen_flags: <defaults>
</compile_context>

<pallas_src>
import jax
import jax.numpy as jnp
from jax.experimental import pallas as pl
from jax.experimental.pallas import tpu as pltpu

_H1 = 128      # first hidden width (already lane-dense)
_H2 = 64       # second hidden width (logical)
_OUT = 15      # classifier output width (logical)
_LANE = 128    # padded lane-dense width for hidden-2 and output


def _mlp_kernel(x_ref, w1_ref, b1_ref, w2_ref, b2_ref, w3_ref, b3_ref, o_ref):
    # Three fused MXU matmuls (bf16 operands, f32 accumulation) with f32
    # bias-add + ReLU on the VPU in between. All shapes are lane-dense.
    x = x_ref[...]  # (TB, in_features), bf16

    h1 = jnp.dot(x, w1_ref[...], preferred_element_type=jnp.float32) + b1_ref[...]
    h1 = jnp.maximum(h1, 0.0)

    h2 = jnp.dot(h1.astype(jnp.bfloat16), w2_ref[...],
                 preferred_element_type=jnp.float32) + b2_ref[...]
    h2 = jnp.maximum(h2, 0.0)

    out = jnp.dot(h2.astype(jnp.bfloat16), w3_ref[...],
                  preferred_element_type=jnp.float32) + b3_ref[...]
    o_ref[...] = out.astype(o_ref.dtype)


def _round_up(n, m):
    return ((n + m - 1) // m) * m


def _pad_to(a, shape):
    return jnp.pad(a, [(0, s - d) for d, s in zip(a.shape, shape)])


def classifier_forward(x, params, *, block_b=512):
    """x: (B, in_features) float32. params: dict of w1,b1,w2,b2,w3,b3.

    Returns (B, 15) float32 logits, matching the PyTorch module.
    """
    B, in_features = x.shape

    # ---- parameter prep: lane-dense padding (zeros), bf16 MXU operands ----
    w1 = params["w1"].astype(jnp.bfloat16)                        # (in, 128)
    b1 = params["b1"].astype(jnp.float32)                         # (1, 128)
    w2 = _pad_to(params["w2"], (_H1, _LANE)).astype(jnp.bfloat16)  # (128, 128)
    b2 = _pad_to(params["b2"], (1, _LANE)).astype(jnp.float32)     # (1, 128)
    w3 = _pad_to(params["w3"], (_LANE, _LANE)).astype(jnp.bfloat16)  # (128, 128)
    b3 = _pad_to(params["b3"], (1, _LANE)).astype(jnp.float32)       # (1, 128)
    # Padded lanes: zero weight cols + zero bias -> ReLU(0)=0 in h2; zero rows
    # of w3 contribute nothing; padded output cols are exactly 0 and sliced off.

    # ---- batch tiling: TB multiple of 8, pad B up to a multiple of TB ----
    TB = min(_round_up(block_b, 8), _round_up(B, 8))
    Bp = _round_up(B, TB)
    x_bf = x.astype(jnp.bfloat16)
    if Bp != B:
        x_bf = jnp.pad(x_bf, ((0, Bp - B), (0, 0)))

    grid = (Bp // TB,)

    const = lambda i: (0, 0)  # weights/biases stay resident across grid steps

    out_padded = pl.pallas_call(
        _mlp_kernel,
        out_shape=jax.ShapeDtypeStruct((Bp, _LANE), x.dtype),
        grid=grid,
        in_specs=[
            pl.BlockSpec((TB, in_features), lambda i: (i, 0)),  # x tile (pipelined)
            pl.BlockSpec((in_features, _H1), const),            # w1
            pl.BlockSpec((1, _H1), const),                      # b1
            pl.BlockSpec((_H1, _LANE), const),                  # w2 (padded)
            pl.BlockSpec((1, _LANE), const),                    # b2 (padded)
            pl.BlockSpec((_LANE, _LANE), const),                # w3 (padded)
            pl.BlockSpec((1, _LANE), const),                    # b3 (padded)
        ],
        out_specs=pl.BlockSpec((TB, _LANE), lambda i: (i, 0)),
        compiler_params=pltpu.CompilerParams(
            dimension_semantics=("parallel",)),
    )(x_bf, w1, b1, w2, b2, w3, b3)

    return out_padded[:B, :_OUT]


def init_params(key, in_features):
    """Deterministic init mirroring nn.Linear default (U[-1/sqrt(fan_in), 1/sqrt(fan_in)]).

    Weights stored as (in, out) == transpose of PyTorch's (out, in)."""
    dims = [(in_features, _H1), (_H1, _H2), (_H2, _OUT)]
    params = {}
    for i, (fan_in, fan_out) in enumerate(dims, start=1):
        key, kw, kb = jax.random.split(key, 3)
        bound = 1.0 / (fan_in ** 0.5)
        params[f"w{i}"] = jax.random.uniform(
            kw, (fan_in, fan_out), jnp.float32, -bound, bound)
        params[f"b{i}"] = jax.random.uniform(
            kb, (1, fan_out), jnp.float32, -bound, bound)
    return params


def _reference(x, p):
    h1 = jnp.maximum(x @ p["w1"] + p["b1"], 0.0)
    h2 = jnp.maximum(h1 @ p["w2"] + p["b2"], 0.0)
    return h2 @ p["w3"] + p["b3"]


if __name__ == "__main__":
    key = jax.random.PRNGKey(0)
    key, kx = jax.random.split(key)

    batch, in_features = 64, 32
    x = jax.random.normal(kx, (batch, in_features), jnp.float32)
    params = init_params(key, in_features)

    # block_b=32 -> grid of 2 batch tiles (exercises the pipelined grid path).
    out = classifier_forward(x, params, block_b=32)
    out = jax.block_until_ready(out)

    ref = _reference(x, params)  # f32 reference
    assert out.shape == (batch, _OUT), out.shape
    # bf16 MXU operands with f32 accumulation -> loosened tolerance vs f32 ref.
    assert jnp.allclose(out, ref, atol=1e-1, rtol=1e-1), (
        "mismatch vs reference, max abs diff = %f" % float(jnp.max(jnp.abs(out - ref))))

    print("KERNEL_OK")
</pallas_src>

<mosaic_0001>
module attributes {stable_mosaic.version = 11 : i64} {
  func.func @_mlp_kernel(%arg0: i32, %arg1: memref<32x32xbf16, #tpu.memory_space<vmem>>, %arg2: memref<32x128xbf16, #tpu.memory_space<vmem>>, %arg3: memref<1x128xf32, #tpu.memory_space<vmem>>, %arg4: memref<128x128xbf16, #tpu.memory_space<vmem>>, %arg5: memref<1x128xf32, #tpu.memory_space<vmem>>, %arg6: memref<128x128xbf16, #tpu.memory_space<vmem>>, %arg7: memref<1x128xf32, #tpu.memory_space<vmem>>, %arg8: memref<32x128xf32, #tpu.memory_space<vmem>>) attributes {dimension_semantics = [#tpu.dimension_semantics<parallel>], iteration_bounds = array<i64: 2>, scalar_prefetch = 0 : i64, scratch_operands = 0 : i64, tpu.core_type = #tpu.core_type<tc>, window_params = [{transform_indices = @transform_0, window_bounds = array<i64: 32, 32>}, {pipeline_mode = #tpu.pipeline_mode<synchronous>, transform_indices = @transform_1, window_bounds = array<i64: 32, 128>}, {pipeline_mode = #tpu.pipeline_mode<synchronous>, transform_indices = @transform_2, window_bounds = array<i64: 1, 128>}, {pipeline_mode = #tpu.pipeline_mode<synchronous>, transform_indices = @transform_3, window_bounds = array<i64: 128, 128>}, {pipeline_mode = #tpu.pipeline_mode<synchronous>, transform_indices = @transform_4, window_bounds = array<i64: 1, 128>}, {pipeline_mode = #tpu.pipeline_mode<synchronous>, transform_indices = @transform_5, window_bounds = array<i64: 128, 128>}, {pipeline_mode = #tpu.pipeline_mode<synchronous>, transform_indices = @transform_6, window_bounds = array<i64: 1, 128>}, {transform_indices = @transform_7, window_bounds = array<i64: 32, 128>}]} {
    %c0 = arith.constant 0 : index
    %c0_0 = arith.constant 0 : index
    %0 = vector.load %arg1[%c0, %c0_0] : memref<32x32xbf16, #tpu.memory_space<vmem>>, vector<32x32xbf16>
    %c0_1 = arith.constant 0 : index
    %c0_2 = arith.constant 0 : index
    %1 = vector.load %arg2[%c0_1, %c0_2] : memref<32x128xbf16, #tpu.memory_space<vmem>>, vector<32x128xbf16>
    %cst = arith.constant dense<0.000000e+00> : vector<32x128xf32>
    %2 = tpu.matmul %0, %1, %cst {dimension_numbers = #tpu.dot_dimension_numbers<[1], [0], [0], [1], [0, 0, 1, 1], [], []>} : vector<32x32xbf16>, vector<32x128xbf16>, vector<32x128xf32> -> vector<32x128xf32>
    %c0_3 = arith.constant 0 : index
    %c0_4 = arith.constant 0 : index
    %3 = vector.load %arg3[%c0_3, %c0_4] : memref<1x128xf32, #tpu.memory_space<vmem>>, vector<1x128xf32>
    %4 = vector.broadcast %3 : vector<1x128xf32> to vector<32x128xf32>
    %5 = arith.addf %2, %4 : vector<32x128xf32>
    %cst_5 = arith.constant 0.000000e+00 : f32
    %6 = vector.broadcast %cst_5 : f32 to vector<32x128xf32>
    %7 = arith.maximumf %5, %6 : vector<32x128xf32>
    %8 = arith.truncf %7 : vector<32x128xf32> to vector<32x128xbf16>
    %c0_6 = arith.constant 0 : index
    %c0_7 = arith.constant 0 : index
    %9 = vector.load %arg4[%c0_6, %c0_7] : memref<128x128xbf16, #tpu.memory_space<vmem>>, vector<128x128xbf16>
    %cst_8 = arith.constant dense<0.000000e+00> : vector<32x128xf32>
    %10 = tpu.matmul %8, %9, %cst_8 {dimension_numbers = #tpu.dot_dimension_numbers<[1], [0], [0], [1], [0, 0, 1, 1], [], []>} : vector<32x128xbf16>, vector<128x128xbf16>, vector<32x128xf32> -> vector<32x128xf32>
    %c0_9 = arith.constant 0 : index
    %c0_10 = arith.constant 0 : index
    %11 = vector.load %arg5[%c0_9, %c0_10] : memref<1x128xf32, #tpu.memory_space<vmem>>, vector<1x128xf32>
    %12 = vector.broadcast %11 : vector<1x128xf32> to vector<32x128xf32>
    %13 = arith.addf %10, %12 : vector<32x128xf32>
    %cst_11 = arith.constant 0.000000e+00 : f32
    %14 = vector.broadcast %cst_11 : f32 to vector<32x128xf32>
    %15 = arith.maximumf %13, %14 : vector<32x128xf32>
    %16 = arith.truncf %15 : vector<32x128xf32> to vector<32x128xbf16>
    %c0_12 = arith.constant 0 : index
    %c0_13 = arith.constant 0 : index
    %17 = vector.load %arg6[%c0_12, %c0_13] : memref<128x128xbf16, #tpu.memory_space<vmem>>, vector<128x128xbf16>
    %cst_14 = arith.constant dense<0.000000e+00> : vector<32x128xf32>
    %18 = tpu.matmul %16, %17, %cst_14 {dimension_numbers = #tpu.dot_dimension_numbers<[1], [0], [0], [1], [0, 0, 1, 1], [], []>} : vector<32x128xbf16>, vector<128x128xbf16>, vector<32x128xf32> -> vector<32x128xf32>
    %c0_15 = arith.constant 0 : index
    %c0_16 = arith.constant 0 : index
    %19 = vector.load %arg7[%c0_15, %c0_16] : memref<1x128xf32, #tpu.memory_space<vmem>>, vector<1x128xf32>
    %20 = vector.broadcast %19 : vector<1x128xf32> to vector<32x128xf32>
    %21 = arith.addf %18, %20 : vector<32x128xf32>
    %c0_17 = arith.constant 0 : index
    %c0_18 = arith.constant 0 : index
    %22 = vector.load %arg8[%c0_17, %c0_18] : memref<32x128xf32, #tpu.memory_space<vmem>>, vector<32x128xf32>
    tpu.vector_store %arg8[%c0_17, %c0_18], %21 {strides = array<i32>} : memref<32x128xf32, #tpu.memory_space<vmem>>, vector<32x128xf32>,
    return
  }
  func.func @transform_0(%arg0: i32) -> (i32, i32) {
    %c0_i32 = arith.constant 0 : i32
    %c0_i32_0 = arith.constant 0 : i32
    return %arg0, %c0_i32 : i32, i32
  }
  func.func @transform_1(%arg0: i32) -> (i32, i32) {
    %c0_i32 = arith.constant 0 : i32
    %c0_i32_0 = arith.constant 0 : i32
    %c0_i32_1 = arith.constant 0 : i32
    return %c0_i32, %c0_i32_0 : i32, i32
  }
  func.func @transform_2(%arg0: i32) -> (i32, i32) {
    %c0_i32 = arith.constant 0 : i32
    %c0_i32_0 = arith.constant 0 : i32
    %c0_i32_1 = arith.constant 0 : i32
    return %c0_i32, %c0_i32_0 : i32, i32
  }
  func.func @transform_3(%arg0: i32) -> (i32, i32) {
    %c0_i32 = arith.constant 0 : i32
    %c0_i32_0 = arith.constant 0 : i32
    %c0_i32_1 = arith.constant 0 : i32
    return %c0_i32, %c0_i32_0 : i32, i32
  }
  func.func @transform_4(%arg0: i32) -> (i32, i32) {
    %c0_i32 = arith.constant 0 : i32
    %c0_i32_0 = arith.constant 0 : i32
    %c0_i32_1 = arith.constant 0 : i32
    return %c0_i32, %c0_i32_0 : i32, i32
  }
  func.func @transform_5(%arg0: i32) -> (i32, i32) {
    %c0_i32 = arith.constant 0 : i32
    %c0_i32_0 = arith.constant 0 : i32
    %c0_i32_1 = arith.constant 0 : i32
    return %c0_i32, %c0_i32_0 : i32, i32
  }
  func.func @transform_6(%arg0: i32) -> (i32, i32) {
    %c0_i32 = arith.constant 0 : i32
    %c0_i32_0 = arith.constant 0 : i32
    %c0_i32_1 = arith.constant 0 : i32
    return %c0_i32, %c0_i32_0 : i32, i32
  }
  func.func @transform_7(%arg0: i32) -> (i32, i32) {
    %c0_i32 = arith.constant 0 : i32
    %c0_i32_0 = arith.constant 0 : i32
    return %arg0, %c0_i32 : i32, i32
  }
}

</mosaic_0001>

<bundles_post_ra>
// kernel: tpu_custom_call.1
= control target key start
LH: loop header
LB: loop body
LE: loop exit
PB: predicated region body
PF: predicated region fallthrough
CT: control target
= control target key end

     0   :  { %12 = vsyncpa [#allocation3], 0  ;;  %s1338_s0 = inlined_call_operand.vmem [shape: bf16[64,32], index: 0, kind: input, shape index: {}]   ;;  %s1339_s1 = inlined_call_operand.hbm [shape: bf16[32,128], index: 1, kind: input, shape index: {}]   ;;  %s1340_s2 = inlined_call_operand.vmem [shape: f32[1,128], index: 2, kind: input, shape index: {}]   ;;  %s1341_s3 = inlined_call_operand.hbm [shape: bf16[128,128], index: 3, kind: input, shape index: {}]   ;;  %s1342_s4 = inlined_call_operand.vmem [shape: f32[1,128], index: 4, kind: input, shape index: {}]   ;;  %s1343_s5 = inlined_call_operand.vmem [shape: bf16[128,128], index: 5, kind: input, shape index: {}]   ;;  %s1344_s6 = inlined_call_operand.vmem [shape: f32[1,128], index: 6, kind: input, shape index: {}]   ;;  %s1345_s7 = inlined_call_operand.hbm [shape: f32[64,128], index: 7, kind: output, shape index: {}]  }
   0x1   :  { %13 = vsyncpa [#allocation6], 0 }
   0x2   :  { %14 = vsyncpa [#allocation4], 0 }
   0x3   :  { %16 = vsyncpa [#allocation4 + $0x1], 0  ;;  %s1131_s24 = smov 0   ;;  %s1133_s25 = smov 0  }
   0x4   :  { %s1135_s26 = smov 0   ;;  %s1137_s27 = smov 0  }
   0x5 LB: > { %s1152_s28 = sadd.s32 4294967295, %s1082_s27   ;;  %s758_s29 = sadd.s32 4294967294, %s1082_s27   ;;  %s1082_s27 = sphi %s1137_s27, %s1365_s27   ;;  %s1078_s26 = sphi %s1135_s26, %s1364_s26   ;;  %s1074_s25 = sphi %s1133_s25, %s1363_s25   ;;  %s1070_s24 = sphi %s1131_s24, %s1362_s24  }
   0x6   : > { %s1156_s30 = sadd.s32 1, %s1082_s27   ;;  %s181_s8 = sadd.s32 1, %s1078_s26 }
   0x7   : > { %s178_s9 = ssub.s32 %s1082_s27, %s1156_s30  ;;  %p191_p0 = scmp.ne.s32.totalorder %s1078_s26, %s1074_s25 }
   0x8   : > { %p179_p1 = scmp.eq.s32.totalorder %s178_s9, 0  ;;  %p192_p2 = scmp.eq.s32.totalorder %s1152_s28, 1 }
   0x9   : > { %p197_p3 = scmp.ne.s32.totalorder %s1074_s25, %s1070_s24  ;;  %p198_p4 = scmp.eq.s32.totalorder %s758_s29, 1 }
   0xa   : > { %s1167_s10 = scalar_select %p179_p1, %s1078_s26, %s181_s8  }
   0xb   : > { %p1169_p5 = por %p192_p2, %p191_p0  ;;  %p1173_p6 = por %p198_p4, %p197_p3 }
   0xc   : > { %1349 = sst [smem:[#allocation11_spill]] %s1167_s10  ;;  %p759_p7 = scmp.ge.s32.totalorder %s1082_s27, 1 }
   0xd   : > { %s1350_s11 = scalar_select %p1169_p5, 1, 0 }
   0xe   : > { %s1351_s12 = scalar_select %p1173_p6, 1, 0 }
   0xf   : > { %p205_p8 = scmp.lt.s32.totalorder %s1082_s27, 3  ;;  %p1346_p9 = scmp.eq.s32.totalorder %s1152_s28, 0 }
  0x10   : > { %s1084_s14 = smov [#allocation2]   ;;  %s1085_s17 = smov [#allocation5]  }
  0x11   : > { %p1180_p10 = pnand %p759_p7, %p205_p8  ;;  %s217_s15 = sshll.u32 %s1084_s14, 4  ;;  %s218_s15 = int_to_ptr.vmem [resolvable:$true] %s217_s15 }
  0x12   : > { %s233_s18 = sshll.u32 %s1085_s17, 4  ;;  %s956_s21 = scalar_lea.hbm %s1339_s1, 256  ;;  %s1192_s18 = int_to_ptr.vmem [resolvable:$true] %s233_s18 }
  0x13   : > { %s1352_s13 = scalar_select %p1180_p10, 1, 0 }
  0x14   : > { %p882_p11 = pneg %p1180_p10  ;;  %p957_p13 = scmp.ne.s32.totalorder %s1339_s1, %s956_s21 }
  0x15   : > { %p963_p3 = scmp.lt.u32.totalorder %s956_s21, %s1339_s1 }
  0x16   : > { %p1188_p12 = pnand %p1346_p9, %p882_p11 }
  0x18   : > { %p958_p0 = pneg %p1188_p12 }
  0x1a   : > { %p959_p1 = pnand %p958_p0, %p957_p13 }
  0x1c   : > { %p960_p2 = pneg %p959_p1 }
  0x1e   : > { %p965_p4 = pnand %p963_p3, %p960_p2 }
  0x20   : > { %968 = shalt.err (!%p965_p4)
}
  0x21   : > { %s969_s9 = scalar_lea.vmem %s218_s15, 256  ;;  %p977_p9 = scmp.lt.s32.totalorder %s218_s15, %s218_s15 }
  0x22   : > { %p970_p7 = scmp.ne.s32.totalorder %s218_s15, %s969_s9  ;;  %p978_p6 = scmp.lt.s32.totalorder %s969_s9, %s969_s9 }
  0x24   : > { %p972_p8 = pnand %p970_p7, %p958_p0  ;;  %p979_p5 = por %p978_p6, %p977_p9 }
  0x26   : > { %p973_p11 = pneg %p972_p8 }
  0x28   : > { %p980_p10 = pnand %p979_p5, %p973_p11 }
  0x2a   : > { %983 = shalt.err (!%p980_p10)
}
  0x2b   : > { %s1086_s14 = smov 64   ;;  %s1087_s17 = smov 4  }
  0x2c   : > { %885 = dma.hbm_to_vmem [thread:$0]  (!%p1188_p12), %s1339_s1, 256, %s218_s15, [#allocation3], %s1086_s14, %s1086_s14, %s1087_s17  }
  0x2d   : > { %s984_s23 = scalar_lea.hbm %s1341_s3, 1024 }
  0x2e   : > { %p985_p13 = scmp.ne.s32.totalorder %s1341_s3, %s984_s23  ;;  %p991_p9 = scmp.lt.u32.totalorder %s984_s23, %s1341_s3 }
  0x30   : > { %p987_p5 = pnand %p985_p13, %p958_p0 }
  0x32   : > { %p988_p6 = pneg %p987_p5 }
  0x34   : > { %p993_p10 = pnand %p991_p9, %p988_p6 }
  0x36   : > { %996 = shalt.err (!%p993_p10)
}
  0x37   : > { %s997_s15 = scalar_lea.vmem %s1192_s18, 1024  ;;  %p1005_p4 = scmp.lt.s32.totalorder %s1192_s18, %s1192_s18 }
  0x38   : > { %p998_p1 = scmp.ne.s32.totalorder %s1192_s18, %s997_s15  ;;  %p1006_p7 = scmp.lt.s32.totalorder %s997_s15, %s997_s15 }
  0x3a   : > { %p1000_p2 = pnand %p998_p1, %p958_p0  ;;  %p1007_p8 = por %p1006_p7, %p1005_p4 }
  0x3c   : > { %p1001_p3 = pneg %p1000_p2 }
  0x3e   : > { %p1008_p11 = pnand %p1007_p8, %p1001_p3 }
  0x40   : > { %1011 = shalt.err (!%p1008_p11)
}
  0x41   : > { %888 = dma.hbm_to_vmem [thread:$0]  (!%p1188_p12), %s1341_s3, 1024, %s1192_s18, [#allocation6], %s1086_s14, %s1086_s14, %s1087_s17  }
  0x42   : > { %p1354_p13 = scmp.ne.s32.totalorder %s1352_s13, 0 }
  0x43   : > { %p1355_p5 = scmp.eq.s32.totalorder (!%p1354_p13), %s1152_s28, 0 }
  0x44   : > { %267 = sbr.rel (%p1354_p13) target bundleno = 765 (0x2fd), region = 48 }
  0x4b   : > { %1057 = dma.done.wait (%p1355_p5), [#allocation3], 256   ;;  %p1356_p0 = pmov %p1355_p5 }
  0x4d   : > { %1059 = vsyncadd (%p1356_p0), [#allocation3], 4294967040  ;;  %p1357_p6 = pmov %p1356_p0 }
  0x4e   : > { %p1358_p9 = pmov %p1356_p0 }
  0x4f   : > { %1061 = dma.done.wait (%p1357_p6), [#allocation6], 1024  }
  0x50   : > { %1063 = vsyncadd (%p1358_p9), [#allocation6], 4294966272  ;;  %s767_s16 = sshll.u32 %s1152_s28, 2  ;;  %v936_v0 = vld [vmem:[#allocation2] sm:$0xff]   ;;  %v937_v1 = vld [vmem:[#allocation2 + $0x8] sm:$0xff]   ;;  %vm348_vm0 = vcmask 261120  }
  0x51   : > { %p304_p10 = scmp.lt.s32.totalorder %s767_s16, 7  ;;  %824 = vmatprep.subr.bf16.mxu0 %v936_v0  ;;  %v940_v3 = vld [vmem:[#allocation5] sm:$0xff]   ;;  %v941_v4 = vld [vmem:[#allocation5 + $0x8] sm:$0xff]   ;;  %v942_v6 = vld [vmem:[#allocation5 + $0x10] sm:$0xff]   ;;  %s300_s8 = sand.u32 1, %s1074_s25  }
  0x52   : > { %825 = vmatpush3.bf16.msra.mxu0 %v936_v0  ;;  %832 = vmatprep.subr.bf16.mxu1 %v940_v3  ;;  %v943_v7 = vld [vmem:[#allocation5 + $0x18] sm:$0xff]   ;;  %v944_v8 = vld [vmem:[#allocation5 + $0x20] sm:$0xff]   ;;  %v945_v9 = vld [vmem:[#allocation5 + $0x28] sm:$0xff]   ;;  %s766_s9 = sshll.u32 %s300_s8, 5  ;;  %p1359_p1 = scmp.ne.s32.totalorder %s1350_s11, 0 }
  0x53   : > { %s1367_s16 = smov (!%p304_p10, %s767_s16), 7  ;;  %826 = vmatprep.subr.bf16.mxu0 %v937_v1  ;;  %833 = vmatpush3.bf16.msra.mxu1 %v940_v3  ;;  %v946_v10 = vld [vmem:[#allocation5 + $0x30] sm:$0xff]   ;;  %v947_v11 = vld [vmem:[#allocation5 + $0x38] sm:$0xff]   ;;  %v950_v14 = vld [vmem:[%s1343_s5 + $0x10] sm:$0xff]   ;;  %s302_s19 = scalar_lea.vmem [#allocation7], %s766_s9 }
  0x54   : > { %s768_s18 = sshll.u32 %s1367_s16, 2  ;;  %834 = vmatprep.subr.bf16.mxu1 %v941_v4  ;;  %v948_v12 = vld [vmem:[%s1343_s5] sm:$0xff]   ;;  %v949_v13 = vld [vmem:[%s1343_s5 + $0x8] sm:$0xff]   ;;  %v951_v15 = vld [vmem:[%s1343_s5 + $0x18] sm:$0xff]   ;;  %s674_s16 = sshll.u32 %s302_s19, 4  ;;  %s1290_s16 = int_to_ptr.vmem [resolvable:$true] %s674_s16 }
  0x55   : > { %s307_s17 = scalar_lea.vmem %s1338_s0, %s768_s18  ;;  %v952_v16 = vld [vmem:[%s1343_s5 + $0x20] sm:$0xff]   ;;  %v953_v17 = vld [vmem:[%s1343_s5 + $0x28] sm:$0xff]   ;;  %v954_v33 = vld [vmem:[%s1343_s5 + $0x30] sm:$0xff]   ;;  %s799_s18 = sshll.u32 %s1152_s28, 9 }
  0x56   : > { %v938_v2 = vld [vmem:[%s307_s17] sm:$0xff]   ;;  %v939_v5 = vld [vmem:[%s307_s17 + $0x8] sm:$0xff]   ;;  %827 = vmatpush3.bf16.msra.mxu0 %v937_v1  ;;  %v955_v34 = vld [vmem:[%s1343_s5 + $0x38] sm:$0xff]   ;;  %s1295_s17 = scalar_lea.hbm %s1345_s7, %s799_s18  ;;  %s1297_s28 = scalar_lea.sflag [#allocation4], %s300_s8 }
  0x57   : > { %828 = vmatprep.mubr.msk.bf16.mxu0 %vm348_vm0, %v938_v2  ;;  %835 = vmatpush3.bf16.msra.mxu1 %v941_v4  ;;  %v769_v18 = vld [vmem:[%s1340_s2] ss:$0 sm:$0xff]  ;;  %s1012_s20 = scalar_lea.vmem %s1290_s16, 512  ;;  %s1088_s21 = smov [#allocation7]  }
  0x58   : > { %836 = vmatprep.subr.bf16.mxu1 %v942_v6  ;;  %852 = vmatprep.subr.bf16.mxu0 %v948_v12  ;;  %v776_v35 = vld [vmem:[%s1342_s4] ss:$0 sm:$0xff]  ;;  %p1013_p12 = scmp.ne.s32.totalorder %s1290_s16, %s1012_s20  ;;  %s1016_s22 = sshll.u32 %s1088_s21, 4  ;;  %s1017_s22 = int_to_ptr.vmem [resolvable:$false] %s1016_s22 }
  0x59   : > { %829 = vmatmul.mubr.msk.bf16.vlgmr.msra.gmra.mrb[0].mxu0 %vm348_vm0, %v939_v5  ;;  %v785_v50 = vld [vmem:[%s1344_s6] ss:$0 sm:$0xff]  ;;  %s1018_s23 = scalar_lea.vmem %s1017_s22, 1024  ;;  %p1019_p4 = scmp.lt.s32.totalorder %s1290_s16, %s1017_s22 }
  0x5a   : > { %853 = vmatpush3.bf16.msra.mxu0 %v948_v12  ;;  %p1014_p2 = pnand %p1013_p12, %p1359_p1  ;;  %p1020_p7 = scmp.lt.s32.totalorder %s1018_s23, %s1012_s20 }
  0x5b   : > { %837 = vmatpush3.bf16.msra.mxu1 %v942_v6  ;;  %854 = vmatprep.subr.bf16.mxu0 %v949_v13 }
  0x5c   : > { %838 = vmatprep.subr.bf16.mxu1 %v943_v7  ;;  %p1015_p3 = pneg %p1014_p2  ;;  %p1021_p8 = por %p1020_p7, %p1019_p4 }
  0x5e   : > { %855 = vmatpush3.bf16.msra.mxu0 %v949_v13  ;;  %p1022_p11 = pnand %p1021_p8, %p1015_p3 }
  0x5f   : > { %839 = vmatpush3.bf16.msra.mxu1 %v943_v7  ;;  %856 = vmatprep.subr.bf16.mxu0 %v950_v14 }
  0x60   : > { %840 = vmatprep.subr.bf16.mxu1 %v944_v8 }
  0x62   : > { %857 = vmatpush3.bf16.msra.mxu0 %v950_v14 }
  0x63   : > { %841 = vmatpush3.bf16.msra.mxu1 %v944_v8  ;;  %858 = vmatprep.subr.bf16.mxu0 %v951_v15 }
  0x64   : > { %842 = vmatprep.subr.bf16.mxu1 %v945_v9 }
  0x66   : > { %859 = vmatpush3.bf16.msra.mxu0 %v951_v15 }
  0x67   : > { %843 = vmatpush3.bf16.msra.mxu1 %v945_v9  ;;  %860 = vmatprep.subr.bf16.mxu0 %v952_v16 }
  0x68   : > { %844 = vmatprep.subr.bf16.mxu1 %v946_v10 }
  0x6a   : > { %861 = vmatpush3.bf16.msra.mxu0 %v952_v16 }
  0x6b   : > { %845 = vmatpush3.bf16.msra.mxu1 %v946_v10  ;;  %862 = vmatprep.subr.bf16.mxu0 %v953_v17 }
  0x6c   : > { %846 = vmatprep.subr.bf16.mxu1 %v947_v11 }
  0x6e   : > { %863 = vmatpush3.bf16.msra.mxu0 %v953_v17 }
  0x6f   : > { %847 = vmatpush3.bf16.msra.mxu1 %v947_v11  ;;  %864 = vmatprep.subr.bf16.mxu0 %v954_v33 }
  0x72   : > { %865 = vmatpush3.bf16.msra.mxu0 %v954_v33 }
  0x73   : > { %866 = vmatprep.subr.bf16.mxu0 %v955_v34 }
  0x76   : > { %867 = vmatpush3.bf16.msra.mxu0 %v955_v34 }
 0x12c   : > { %v830_v19 = vpop.f32.mrb[0].mxu0 }
 0x12d   : > { %v398_v20 = vadd.f32 %v830_v19, %v769_v18  ;;  %v389_v21 = vpop.f32.mrb[1].mxu0 }
 0x12e   : > { %v390_v22 = vadd.f32 %v769_v18, %v389_v21  ;;  %v831_v23 = vpop.f32.mrb[2].mxu0 }
 0x12f   : > { %v401_v24 = vadd.f32 %v831_v23, %v769_v18  ;;  %v392_v25 = vpop.f32.mrb[3].mxu0  ;;  %v406_v27 = vmax.f32 %v398_v20, 0.0 }
 0x130   : > { %v393_v26 = vadd.f32 %v769_v18, %v392_v25  ;;  %v404_v29 = vmax.f32 %v390_v22, 0.0 }
 0x131   : > { %v407_v28 = vmax.f32 %v401_v24, 0.0 }
 0x132   : > { %v405_v30 = vmax.f32 %v393_v26, 0.0 }
 0x133   : > { %v409_v31 = vpack.c.bf16 %v407_v28, %v406_v27 }
 0x134   : > { %v408_v32 = vpack.c.bf16 %v405_v30, %v404_v29 }
 0x136   : > { %848 = vmatprep.mubr.bf16.mxu1 %v408_v32 }
 0x137   : > { %849 = vmatmul.mubr.bf16.vlgmr.msra.gmra.mrb[0].mxu1 %v409_v31 }
 0x20a   : > { %v850_v36 = vpop.f32.mrb[0].mxu1 }
 0x20b   : > { %v524_v37 = vadd.f32 %v850_v36, %v776_v35  ;;  %v515_v38 = vpop.f32.mrb[1].mxu1 }
 0x20c   : > { %v516_v39 = vadd.f32 %v776_v35, %v515_v38  ;;  %v851_v40 = vpop.f32.mrb[2].mxu1 }
 0x20d   : > { %v527_v41 = vadd.f32 %v851_v40, %v776_v35  ;;  %v518_v42 = vpop.f32.mrb[3].mxu1  ;;  %v532_v44 = vmax.f32 %v524_v37, 0.0 }
 0x20e   : > { %v519_v43 = vadd.f32 %v776_v35, %v518_v42  ;;  %v530_v46 = vmax.f32 %v516_v39, 0.0 }
 0x20f   : > { %v533_v45 = vmax.f32 %v527_v41, 0.0 }
 0x210   : > { %v531_v47 = vmax.f32 %v519_v43, 0.0 }
 0x211   : > { %v535_v48 = vpack.c.bf16 %v533_v45, %v532_v44 }
 0x212   : > { %v534_v49 = vpack.c.bf16 %v531_v47, %v530_v46 }
 0x214   : > { %868 = vmatprep.mubr.bf16.mxu0 %v534_v49 }
 0x215   : > { %869 = vmatmul.mubr.bf16.vlgmr.msra.gmra.mrb[4].mxu0 %v535_v48 }
 0x2e8   : > { %v870_v51 = vpop.f32.mrb[4].mxu0 }
 0x2e9   : > { %v650_v52 = vadd.f32 %v870_v51, %v785_v50  ;;  %v641_v53 = vpop.f32.mrb[5].mxu0 }
 0x2ea   : > { %v642_v54 = vadd.f32 %v785_v50, %v641_v53  ;;  %v871_v55 = vpop.f32.mrb[6].mxu0 }
 0x2eb   : > { %658 = vst [vmem:[%s302_s19 + $0x10] sm:$0xff] %v650_v52  ;;  %v653_v56 = vadd.f32 %v871_v55, %v785_v50  ;;  %v644_v57 = vpop.f32.mrb[7].mxu0 }
 0x2ec   : > { %656 = vst [vmem:[%s302_s19] sm:$0xff] %v642_v54  ;;  %v645_v58 = vadd.f32 %v785_v50, %v644_v57 }
 0x2ed   : > { %659 = vst [vmem:[%s302_s19 + $0x18] sm:$0xff] %v653_v56 }
 0x2ee   : > { %657 = vst [vmem:[%s302_s19 + $0x8] sm:$0xff] %v645_v58 }
 0x2ef   : > { %1025 = shalt.err (!%p1022_p11)
}
 0x2f0   : > { %s1026_s29 = scalar_lea.hbm %s1295_s17, 512  ;;  %s1030_s15 = scalar_lea.hbm %s1345_s7, 1024 }
 0x2f1   : > { %p1027_p13 = scmp.ne.s32.totalorder %s1295_s17, %s1026_s29  ;;  %p1031_p6 = scmp.lt.u32.totalorder %s1295_s17, %s1345_s7 }
 0x2f2   : > { %p1032_p9 = scmp.lt.u32.totalorder %s1030_s15, %s1026_s29  ;;  %p1034_p12 = scmp.lt.u32.totalorder %s1026_s29, %s1295_s17 }
 0x2f3   : > { %p1028_p5 = pnand %p1027_p13, %p1359_p1 }
 0x2f4   : > { %p1033_p10 = por %p1032_p9, %p1031_p6 }
 0x2f5   : > { %p1029_p0 = pneg %p1028_p5 }
 0x2f6   : > { %p1035_p2 = por %p1034_p12, %p1033_p10 }
 0x2f8   : > { %p1036_p3 = pnand %p1035_p2, %p1029_p0 }
 0x2fa   : > { %1039 = shalt.err (!%p1036_p3)
}
 0x2fb   : > { %s1089_s18 = smov 128   ;;  %s1090_s14 = smov 8  }
 0x2fc   : > { %880 = dma.vmem_to_hbm [thread:$0]  (%p1359_p1), %s1290_s16, 512, %s1295_s17, %s1297_s28, %s1089_s18, %s1089_s18, %s1090_s14  }
 0x2fd PF: > { %p897_p4 = scmp.ge.s32.totalorder %s1082_s27, 2  ;;  %s689_s13 = sand.u32 1, %s1070_s24  }
 0x2fe   : > { %p1360_p7 = scmp.ne.s32.totalorder %s1351_s12, 0  ;;  %s690_s20 = scalar_lea.sflag [#allocation4], %s689_s13 }
 0x300   : > { %p890_p8 = pnand %p897_p4, %p1360_p7 }
 0x302   : > { %1065 = dma.done.wait (!%p890_p8), %s690_s20, 512  }
 0x303   : > { %1067 = vsyncadd (!%p890_p8), %s690_s20, 4294966784  ;;  %s1361_s21 = sld [smem:[#allocation11_spill]]  ;;  %p19_p11 = scmp.ge.s32.totalorder %s1156_s30, 4  }
 0x304   : > { %s1362_s24 = smov %s1074_s25  ;;  %s1363_s25 = smov %s1078_s26 }
 0x305   : > { %s1365_s27 = smov %s1156_s30  ;;  %21 = sbr.rel (!%p19_p11) target bundleno = 5 (0x5), region = 92 }
 0x309   : > { %s1364_s26 = smov %s1361_s21 }
 0x30c   :  { %695 = vsyncpa [#allocation3], 1 }
 0x30d   :  { %697 = vsyncpa [#allocation3 + $0x1], 1 }
 0x30e   :  { %698 = vsyncpa [#allocation6], 1 }
 0x30f   :  { %699 = vsyncpa [#allocation4], 1 }
 0x310   :  { %701 = vsyncpa [#allocation4 + $0x1], 1 }

</bundles_post_ra>
